<compile_context>
chip_gen: v7x
topology: tpu7x:2x2x1
jax: 0.10.0
libtpu: 0.0.40
codegen_flags: <defaults>
</compile_context>

<pallas_src>
import functools

import jax
import jax.numpy as jnp
import numpy as np
from jax.experimental import pallas as pl
from jax.experimental.pallas import tpu as pltpu


def _reg_l1_kernel(K_pad,            # python int: padded keypoint count
                   feat_ref,         # VMEM (C, HW)        f32  (block DMA / batch)
                   ind_ref,          # VMEM (1, 2*K_pad)   i32  lane-dense indices
                   mask_ref,         # VMEM (1, K_pad)     f32
                   target_ref,       # VMEM (C, K_pad)     f32  channel-major
                   out_ref):         # VMEM (1, 128)       f32  lane0=loss, lane1=msum
    C, HW = feat_ref.shape

    # MXU one-hot gather: onehot[p, j] = (p == ind[j]); padded lanes hold -1
    # so they never match.  gathered = feat @ onehot -> (C, 2*K_pad).
    pos = jax.lax.broadcasted_iota(jnp.int32, (HW, 2 * K_pad), 0)
    onehot = (pos == ind_ref[...]).astype(jnp.float32)
    gathered = jnp.dot(feat_ref[...], onehot,
                       preferred_element_type=jnp.float32)

    # pred[c, k] = (feat[ind0] + feat[ind1]) / 2  -- lane-dense (C, K_pad)
    pred = (gathered[:, :K_pad] + gathered[:, K_pad:]) * 0.5
    m = mask_ref[...]                              # (1, K_pad), bcast over C
    diff = (pred - target_ref[...]) * m
    ad = jnp.abs(diff)
    # smooth_l1, beta = 1.0 (PyTorch F.smooth_l1_loss default)
    sl1 = jnp.where(ad < 1.0, 0.5 * diff * diff, ad - 0.5)

    loss = jnp.sum(sl1)
    msum = C * jnp.sum(m)                          # mask expanded to C channels

    lane = jax.lax.broadcasted_iota(jnp.int32, (1, 128), 1)
    out_ref[...] = jnp.where(lane == 0, loss,
                             jnp.where(lane == 1, msum, 0.0))


def reg_l1_loss(pred, mask, ind, target):
    """pred: (B,C,H,W) f32, mask: (B,K), ind: (B,K,2) int, target: (B,K,C) f32."""
    B, C, H, W = pred.shape
    K = ind.shape[1]
    HW = H * W
    K_pad = pl.cdiv(K, 128) * 128                  # lane-dense keypoint axis

    # NCHW kept: pure reshape, no full-tensor HBM transpose pass.
    feat = pred.reshape(B, C, HW).astype(jnp.float32)

    # Clamp once here (guards OOB indices; documented semantic: clip-gather).
    ind_c = jnp.clip(ind.astype(jnp.int32), 0, HW - 1)          # (B, K, 2)
    # Lane-dense index slab: endpoint 0 in lanes [0:K], endpoint 1 in
    # [K_pad:K_pad+K]; padding is -1 so one-hot rows for pad lanes are zero.
    ind2 = jnp.full((B, 1, 2 * K_pad), -1, jnp.int32)
    ind2 = ind2.at[:, 0, :K].set(ind_c[:, :, 0])
    ind2 = ind2.at[:, 0, K_pad:K_pad + K].set(ind_c[:, :, 1])

    mask_p = jnp.zeros((B, 1, K_pad), jnp.float32)
    mask_p = mask_p.at[:, 0, :K].set(mask.astype(jnp.float32))

    target_t = jnp.zeros((B, C, K_pad), jnp.float32)
    target_t = target_t.at[:, :, :K].set(
        jnp.transpose(target.astype(jnp.float32), (0, 2, 1)))

    kernel = functools.partial(_reg_l1_kernel, K_pad)

    # Explicit VMEM budget: double-buffered inputs + one-hot + temporaries,
    # 2x headroom, clamped to [32 MiB, 64 MiB] (v7x physical VMEM is 64 MiB).
    est_bytes = 4 * (2 * C * HW            # feat tile, double-buffered
                     + 2 * C * K_pad       # target tile, double-buffered
                     + 2 * 4 * K_pad       # mask + ind + out blocks
                     + 2 * HW * K_pad      # one-hot intermediate
                     + 8 * C * K_pad)      # gathered / pred / diff temporaries
    vmem_limit = int(min(max(2 * est_bytes, 32 * 1024 * 1024),
                         64 * 1024 * 1024))

    out = pl.pallas_call(
        kernel,
        out_shape=jax.ShapeDtypeStruct((B, 1, 128), jnp.float32),
        grid_spec=pltpu.PrefetchScalarGridSpec(
            num_scalar_prefetch=0,
            grid=(B,),
            in_specs=[
                pl.BlockSpec((None, C, HW), lambda b: (b, 0, 0)),         # feat
                pl.BlockSpec((None, 1, 2 * K_pad), lambda b: (b, 0, 0)),  # indices
                pl.BlockSpec((None, 1, K_pad), lambda b: (b, 0, 0)),      # mask
                pl.BlockSpec((None, C, K_pad), lambda b: (b, 0, 0)),      # target
            ],
            out_specs=pl.BlockSpec((None, 1, 128), lambda b: (b, 0, 0)),
        ),
        compiler_params=pltpu.CompilerParams(
            dimension_semantics=("parallel",),     # per-batch -> both v7x TCs
            vmem_limit_bytes=vmem_limit),
    )(feat, ind2, mask_p, target_t)

    loss = jnp.sum(out[:, 0, 0])
    msum = jnp.sum(out[:, 0, 1])
    return loss / (msum + 1e-4)


def _ref_loss(pred, mask, ind, target):
    """Pure-JAX reference mirroring the PyTorch forward."""
    B, C, H, W = pred.shape
    feat = jnp.transpose(pred, (0, 2, 3, 1)).reshape(B, H * W, C)
    g0 = jnp.take_along_axis(feat, ind[:, :, 0:1].astype(jnp.int32), axis=1)
    g1 = jnp.take_along_axis(feat, ind[:, :, 1:2].astype(jnp.int32), axis=1)
    gathered = (g0 + g1) * 0.5
    m = jnp.broadcast_to(mask[:, :, None], gathered.shape).astype(jnp.float32)
    d = gathered * m - target * m
    ad = jnp.abs(d)
    sl1 = jnp.where(ad < 1.0, 0.5 * d * d, ad - 0.5)
    return jnp.sum(sl1) / (jnp.sum(m) + 1e-4)


if __name__ == "__main__":
    B, C, H, W, K = 2, 4, 16, 16, 8
    key = jax.random.PRNGKey(0)
    k1, k2, k3, k4 = jax.random.split(key, 4)

    pred = jax.random.normal(k1, (B, C, H, W), dtype=jnp.float32)
    target = jax.random.normal(k2, (B, K, C), dtype=jnp.float32)
    ind = jax.random.randint(k3, (B, K, 2), 0, H * W, dtype=jnp.int32)
    mask = (jax.random.uniform(k4, (B, K)) < 0.7).astype(jnp.float32)

    out = reg_l1_loss(pred, mask, ind, target)
    out = jax.block_until_ready(out)

    ref = jax.block_until_ready(_ref_loss(pred, mask, ind, target))
    np.testing.assert_allclose(np.asarray(out), np.asarray(ref),
                               rtol=1e-5, atol=1e-5)
    print("KERNEL_OK")
</pallas_src>

<mosaic_0001>
module attributes {stable_mosaic.version = 11 : i64} {
  func.func @_reg_l1_kernel(%arg0: i32, %arg1: memref<1x4x256xf32, #tpu.memory_space<vmem>>, %arg2: memref<1x1x256xi32, #tpu.memory_space<vmem>>, %arg3: memref<1x1x128xf32, #tpu.memory_space<vmem>>, %arg4: memref<1x4x128xf32, #tpu.memory_space<vmem>>, %arg5: memref<1x1x128xf32, #tpu.memory_space<vmem>>) attributes {dimension_semantics = [#tpu.dimension_semantics<parallel>], iteration_bounds = array<i64: 2>, scalar_prefetch = 0 : i64, scratch_operands = 0 : i64, tpu.core_type = #tpu.core_type<tc>, window_params = [{transform_indices = @transform_0, window_bounds = array<i64: 1, 4, 256>}, {transform_indices = @transform_1, window_bounds = array<i64: 1, 1, 256>}, {transform_indices = @transform_2, window_bounds = array<i64: 1, 1, 128>}, {transform_indices = @transform_3, window_bounds = array<i64: 1, 4, 128>}, {transform_indices = @transform_4, window_bounds = array<i64: 1, 1, 128>}]} {
    %0 = tpu.iota {dimensions = array<i32: 0>} : vector<256x256xi32>
    %c0 = arith.constant 0 : index
    %c0_0 = arith.constant 0 : index
    %c0_1 = arith.constant 0 : index
    %1 = vector.load %arg2[%c0, %c0_0, %c0_1] : memref<1x1x256xi32, #tpu.memory_space<vmem>>, vector<1x1x256xi32>
    %2 = vector.shape_cast %1 : vector<1x1x256xi32> to vector<1x256xi32>
    %3 = vector.broadcast %2 : vector<1x256xi32> to vector<256x256xi32>
    %4 = arith.cmpi eq, %0, %3 : vector<256x256xi32>
    %5 = arith.extui %4 : vector<256x256xi1> to vector<256x256xi32>
    %6 = arith.sitofp %5 : vector<256x256xi32> to vector<256x256xf32>
    %c0_2 = arith.constant 0 : index
    %c0_3 = arith.constant 0 : index
    %c0_4 = arith.constant 0 : index
    %7 = vector.load %arg1[%c0_2, %c0_3, %c0_4] : memref<1x4x256xf32, #tpu.memory_space<vmem>>, vector<1x4x256xf32>
    %8 = vector.shape_cast %7 : vector<1x4x256xf32> to vector<4x256xf32>
    %cst = arith.constant dense<0.000000e+00> : vector<4x256xf32>
    %9 = tpu.matmul %8, %6, %cst {dimension_numbers = #tpu.dot_dimension_numbers<[1], [0], [0], [1], [0, 0, 1, 1], [], []>} : vector<4x256xf32>, vector<256x256xf32>, vector<4x256xf32> -> vector<4x256xf32>
    %10 = vector.extract_strided_slice %9 {offsets = [0, 0], sizes = [4, 128], strides = [1, 1]} : vector<4x256xf32> to vector<4x128xf32>
    %11 = vector.extract_strided_slice %9 {offsets = [0, 128], sizes = [4, 128], strides = [1, 1]} : vector<4x256xf32> to vector<4x128xf32>
    %12 = arith.addf %10, %11 : vector<4x128xf32>
    %cst_5 = arith.constant 5.000000e-01 : f32
    %13 = vector.broadcast %cst_5 : f32 to vector<4x128xf32>
    %14 = arith.mulf %12, %13 : vector<4x128xf32>
    %c0_6 = arith.constant 0 : index
    %c0_7 = arith.constant 0 : index
    %c0_8 = arith.constant 0 : index
    %15 = vector.load %arg3[%c0_6, %c0_7, %c0_8] : memref<1x1x128xf32, #tpu.memory_space<vmem>>, vector<1x1x128xf32>
    %16 = vector.shape_cast %15 : vector<1x1x128xf32> to vector<1x128xf32>
    %c0_9 = arith.constant 0 : index
    %c0_10 = arith.constant 0 : index
    %c0_11 = arith.constant 0 : index
    %17 = vector.load %arg4[%c0_9, %c0_10, %c0_11] : memref<1x4x128xf32, #tpu.memory_space<vmem>>, vector<1x4x128xf32>
    %18 = vector.shape_cast %17 : vector<1x4x128xf32> to vector<4x128xf32>
    %19 = arith.subf %14, %18 : vector<4x128xf32>
    %20 = vector.broadcast %16 : vector<1x128xf32> to vector<4x128xf32>
    %21 = arith.mulf %19, %20 : vector<4x128xf32>
    %22 = math.absf %21 : vector<4x128xf32>
    %cst_12 = arith.constant 1.000000e+00 : f32
    %23 = vector.broadcast %cst_12 : f32 to vector<4x128xf32>
    %24 = arith.cmpf olt, %22, %23 : vector<4x128xf32>
    %cst_13 = arith.constant 5.000000e-01 : f32
    %25 = vector.broadcast %cst_13 : f32 to vector<4x128xf32>
    %26 = arith.mulf %25, %21 : vector<4x128xf32>
    %27 = arith.mulf %26, %21 : vector<4x128xf32>
    %cst_14 = arith.constant 5.000000e-01 : f32
    %28 = vector.broadcast %cst_14 : f32 to vector<4x128xf32>
    %29 = arith.subf %22, %28 : vector<4x128xf32>
    %30 = arith.select %24, %27, %29 : vector<4x128xi1>, vector<4x128xf32>
    %31 = vector.shape_cast %30 : vector<4x128xf32> to vector<1x4x128xf32>
    %cst_15 = arith.constant dense<0.000000e+00> : vector<1xf32>
    %32 = vector.multi_reduction <add>, %31, %cst_15 [1, 2] : vector<1x4x128xf32> to vector<1xf32>
    %33 = vector.shape_cast %32 : vector<1xf32> to vector<1x1x1xf32>
    %34 = vector.extract %33[0, 0, 0] : f32 from vector<1x1x1xf32>
    %35 = vector.shape_cast %16 : vector<1x128xf32> to vector<1x1x128xf32>
    %cst_16 = arith.constant dense<0.000000e+00> : vector<1xf32>
    %36 = vector.multi_reduction <add>, %35, %cst_16 [1, 2] : vector<1x1x128xf32> to vector<1xf32>
    %37 = vector.shape_cast %36 : vector<1xf32> to vector<1x1x1xf32>
    %38 = vector.extract %37[0, 0, 0] : f32 from vector<1x1x1xf32>
    %cst_17 = arith.constant 4.000000e+00 : f32
    %39 = arith.mulf %cst_17, %38 : f32
    %40 = tpu.iota {dimensions = array<i32: 1>} : vector<1x128xi32>
    %c0_i32 = arith.constant 0 : i32
    %41 = vector.broadcast %c0_i32 : i32 to vector<1x128xi32>
    %42 = arith.cmpi eq, %40, %41 : vector<1x128xi32>
    %c1_i32 = arith.constant 1 : i32
    %43 = vector.broadcast %c1_i32 : i32 to vector<1x128xi32>
    %44 = arith.cmpi eq, %40, %43 : vector<1x128xi32>
    %cst_18 = arith.constant 0.000000e+00 : f32
    %45 = vector.broadcast %39 : f32 to vector<1x128xf32>
    %46 = vector.broadcast %cst_18 : f32 to vector<1x128xf32>
    %47 = arith.select %44, %45, %46 : vector<1x128xi1>, vector<1x128xf32>
    %48 = vector.broadcast %34 : f32 to vector<1x128xf32>
    %49 = arith.select %42, %48, %47 : vector<1x128xi1>, vector<1x128xf32>
    %c0_19 = arith.constant 0 : index
    %c0_20 = arith.constant 0 : index
    %c0_21 = arith.constant 0 : index
    %50 = vector.load %arg5[%c0_19, %c0_20, %c0_21] : memref<1x1x128xf32, #tpu.memory_space<vmem>>, vector<1x1x128xf32>
    %51 = vector.shape_cast %50 : vector<1x1x128xf32> to vector<1x128xf32>
    %52 = vector.shape_cast %49 : vector<1x128xf32> to vector<1x1x128xf32>
    tpu.vector_store %arg5[%c0_19, %c0_20, %c0_21], %52 {strides = array<i32>} : memref<1x1x128xf32, #tpu.memory_space<vmem>>, vector<1x1x128xf32>,
    return
  }
  func.func @transform_0(%arg0: i32) -> (i32, i32, i32) {
    %c0_i32 = arith.constant 0 : i32
    %c0_i32_0 = arith.constant 0 : i32
    %c0_i32_1 = arith.constant 0 : i32
    return %arg0, %c0_i32, %c0_i32_0 : i32, i32, i32
  }
  func.func @transform_1(%arg0: i32) -> (i32, i32, i32) {
    %c0_i32 = arith.constant 0 : i32
    %c0_i32_0 = arith.constant 0 : i32
    %c0_i32_1 = arith.constant 0 : i32
    return %arg0, %c0_i32, %c0_i32_0 : i32, i32, i32
  }
  func.func @transform_2(%arg0: i32) -> (i32, i32, i32) {
    %c0_i32 = arith.constant 0 : i32
    %c0_i32_0 = arith.constant 0 : i32
    %c0_i32_1 = arith.constant 0 : i32
    return %arg0, %c0_i32, %c0_i32_0 : i32, i32, i32
  }
  func.func @transform_3(%arg0: i32) -> (i32, i32, i32) {
    %c0_i32 = arith.constant 0 : i32
    %c0_i32_0 = arith.constant 0 : i32
    %c0_i32_1 = arith.constant 0 : i32
    return %arg0, %c0_i32, %c0_i32_0 : i32, i32, i32
  }
  func.func @transform_4(%arg0: i32) -> (i32, i32, i32) {
    %c0_i32 = arith.constant 0 : i32
    %c0_i32_0 = arith.constant 0 : i32
    %c0_i32_1 = arith.constant 0 : i32
    return %arg0, %c0_i32, %c0_i32_0 : i32, i32, i32
  }
}

</mosaic_0001>

<bundles_post_ra>
// kernel: tpu_custom_call.1
= control target key start
LH: loop header
LB: loop body
LE: loop exit
PB: predicated region body
PF: predicated region fallthrough
CT: control target
= control target key end

     0   :  { %9 = vsyncpa [#allocation3], 0  ;;  %s1557_s0 = inlined_call_operand.hbm [shape: f32[2,4,256], index: 0, kind: input, shape index: {}]   ;;  %s1558_s1 = inlined_call_operand.hbm [shape: s32[2,1,256], index: 1, kind: input, shape index: {}]   ;;  %s1559_s2 = inlined_call_operand.vmem [shape: f32[2,1,128], index: 2, kind: input, shape index: {}]   ;;  %s1560_s3 = inlined_call_operand.vmem [shape: f32[2,4,128], index: 3, kind: input, shape index: {}]   ;;  %s1561_s4 = inlined_call_operand.hbm [shape: f32[2,1,128], index: 4, kind: output, shape index: {}]  }
   0x1   :  { %11 = vsyncpa [#allocation3 + $0x1], 0 }
   0x2   :  { %12 = vsyncpa [#allocation6], 0 }
   0x3   :  { %14 = vsyncpa [#allocation6 + $0x1], 0 }
   0x4   :  { %15 = vsyncpa [#allocation4], 0 }
   0x5   :  { %17 = vsyncpa [#allocation4 + $0x1], 0  ;;  %s1193_s15 = smov 0   ;;  %s1195_s16 = smov 0  }
   0x6   :  { %s1197_s17 = smov 0   ;;  %s1199_s18 = smov 0  }
   0x7 LB: > { %s1214_s19 = sadd.s32 4294967295, %s1162_s18   ;;  %s764_s20 = sadd.s32 4294967294, %s1162_s18   ;;  %s1162_s18 = sphi %s1199_s18, %s1580_s18   ;;  %s1158_s17 = sphi %s1197_s17, %s1579_s17   ;;  %s1154_s16 = sphi %s1195_s16, %s1578_s16   ;;  %s1150_s15 = sphi %s1193_s15, %s1577_s15  }
   0x8   : > { %s1218_s21 = sadd.s32 1, %s1162_s18   ;;  %s30_s22 = sadd.s32 1, %s1158_s17 }
   0x9   : > { %s27_s23 = ssub.s32 %s1162_s18, %s1218_s21  ;;  %p37_p0 = scmp.ne.s32.totalorder %s1158_s17, %s1154_s16 }
   0xa   : > { %p28_p1 = scmp.eq.s32.totalorder %s27_s23, 0  ;;  %p38_p2 = scmp.eq.s32.totalorder %s1162_s18, 0 }
   0xb   : > { %p43_p3 = scmp.ne.s32.totalorder %s1154_s16, %s1150_s15  ;;  %p44_p4 = scmp.eq.s32.totalorder %s1214_s19, 0 }
   0xc   : > { %s1230_s24 = scalar_select %p28_p1, %s1158_s17, %s30_s22  }
   0xd   : > { %p1232_p5 = por %p38_p2, %p37_p0  ;;  %p1236_p6 = por %p44_p4, %p43_p3 }
   0xe   : > { %p145_p7 = scmp.eq.s32.totalorder %s1214_s19, 1  ;;  %p151_p8 = scmp.eq.s32.totalorder %s764_s20, 1 }
   0xf   : > { %s1565_s26 = scalar_select %p1236_p6, 1, 0 }
  0x10   : > { %p996_p10 = scmp.lt.s32.totalorder %s1162_s18, 2  ;;  %p1243_p11 = por %p145_p7, %p37_p0 }
  0x11   : > { %p1247_p12 = por %p151_p8, %p43_p3  ;;  %s1252_s29 = sand.u32 1, %s1158_s17  }
  0x12   : > { %s1566_s27 = scalar_select %p1243_p11, 1, 0 }
  0x13   : > { %s1567_s28 = scalar_select %p1247_p12, 1, 0 }
  0x14   : > { %s909_s30 = sshll.u32 %s1162_s18, 7  ;;  %s767_s5 = sshll.u32 %s1252_s29, 3 }
  0x15   : > { %s1259_s8 = scalar_lea.hbm %s1557_s0, %s909_s30  ;;  %s175_s9 = scalar_lea.vmem [#allocation2], %s767_s5 }
  0x16   : > { %s183_s10 = sshll.u32 %s175_s9, 4  ;;  %p1263_p13 = pnand %p996_p10, %p1232_p5  ;;  %s1267_s10 = int_to_ptr.vmem [resolvable:$true] %s183_s10 }
  0x17   : > { %s172_s12 = scalar_lea.sflag [#allocation3], %s1252_s29  ;;  %s1032_s13 = scalar_lea.hbm %s1259_s8, 128 }
  0x18   : > { %p1033_p2 = scmp.ne.s32.totalorder %s1259_s8, %s1032_s13  ;;  %p1034_p3 = pneg %p1263_p13 }
  0x19   : > { %s1037_s22 = scalar_lea.hbm %s1557_s0, 256  ;;  %p1038_p5 = scmp.lt.u32.totalorder %s1259_s8, %s1557_s0 }
  0x1a   : > { %p1035_p4 = pnand %p1034_p3, %p1033_p2  ;;  %p1039_p8 = scmp.lt.u32.totalorder %s1037_s22, %s1032_s13 }
  0x1b   : > { %p1041_p9 = scmp.lt.u32.totalorder %s1032_s13, %s1259_s8 }
  0x1c   : > { %p1036_p7 = pneg %p1035_p4  ;;  %p1040_p10 = por %p1039_p8, %p1038_p5 }
  0x1e   : > { %p1042_p0 = por %p1041_p9, %p1040_p10 }
  0x20   : > { %p1043_p1 = pnand %p1042_p0, %p1036_p7 }
  0x22   : > { %1046 = shalt.err (!%p1043_p1)
}
  0x23   : > { %s1047_s30 = scalar_lea.vmem %s1267_s10, 128  ;;  %s1164_s5 = smov [#allocation2]  }
  0x24   : > { %p1048_p2 = scmp.ne.s32.totalorder %s1267_s10, %s1047_s30  ;;  %s1052_s6 = sshll.u32 %s1164_s5, 4  ;;  %s1053_s6 = int_to_ptr.vmem [resolvable:$false] %s1052_s6 }
  0x25   : > { %s1054_s7 = scalar_lea.vmem %s1053_s6, 256  ;;  %p1055_p11 = scmp.lt.s32.totalorder %s1267_s10, %s1053_s6 }
  0x26   : > { %p1050_p4 = pnand %p1048_p2, %p1034_p3  ;;  %p1056_p5 = scmp.lt.s32.totalorder %s1054_s7, %s1047_s30 }
  0x28   : > { %p1051_p12 = pneg %p1050_p4  ;;  %p1057_p8 = por %p1056_p5, %p1055_p11 }
  0x2a   : > { %p1058_p9 = pnand %p1057_p8, %p1051_p12 }
  0x2c   : > { %1061 = shalt.err (!%p1058_p9)
}
  0x2d   : > { %988 = dma.hbm_to_vmem [thread:$0]  (!%p1263_p13), %s1259_s8, 128, %s1267_s10, %s172_s12  }
  0x2e   : > { %p1569_p0 = scmp.lt.s32.totalorder %s1162_s18, 3  ;;  %p1570_p1 = scmp.ge.s32.totalorder %s1162_s18, 1 }
  0x2f   : > { %s770_s13 = sshll.u32 %s1252_s29, 1  ;;  %s910_s14 = sshll.u32 %s1162_s18, 5 }
  0x30   : > { %p1301_p7 = pnand %p1570_p1, %p1569_p0  ;;  %s1310_s23 = scalar_lea.hbm %s1558_s1, %s910_s14 }
  0x31   : > { %s194_s25 = scalar_lea.vmem [#allocation5], %s770_s13  ;;  %s191_s8 = scalar_lea.sflag [#allocation6], %s1252_s29 }
  0x32   : > { %s1571_s9 = scalar_select %p1301_p7, 1, 0 }
  0x33   : > { %s202_s30 = sshll.u32 %s194_s25, 4  ;;  %s1062_s10 = scalar_lea.hbm %s1310_s23, 32  ;;  %s203_s30 = int_to_ptr.vmem [resolvable:$true] %s202_s30 }
  0x34   : > { %p1063_p11 = scmp.ne.s32.totalorder %s1310_s23, %s1062_s10  ;;  %s1067_s6 = scalar_lea.hbm %s1558_s1, 64 }
  0x35   : > { %p1068_p2 = scmp.lt.u32.totalorder %s1310_s23, %s1558_s1  ;;  %p1069_p4 = scmp.lt.u32.totalorder %s1067_s6, %s1062_s10 }
  0x36   : > { %p1065_p12 = pnand %p1063_p11, %p1034_p3  ;;  %p1071_p8 = scmp.lt.u32.totalorder %s1062_s10, %s1310_s23 }
  0x37   : > { %p1070_p5 = por %p1069_p4, %p1068_p2 }
  0x38   : > { %p1066_p10 = pneg %p1065_p12 }
  0x39   : > { %p1072_p9 = por %p1071_p8, %p1070_p5 }
  0x3b   : > { %p1073_p0 = pnand %p1072_p9, %p1066_p10 }
  0x3d   : > { %1076 = shalt.err (!%p1073_p0)
}
  0x3e   : > { %s1077_s29 = scalar_lea.vmem %s203_s30, 32  ;;  %s1165_s13 = smov [#allocation5]  }
  0x3f   : > { %p1078_p1 = scmp.ne.s32.totalorder %s203_s30, %s1077_s29  ;;  %s1082_s20 = sshll.u32 %s1165_s13, 4  ;;  %s1083_s20 = int_to_ptr.vmem [resolvable:$false] %s1082_s20 }
  0x40   : > { %s1084_s22 = scalar_lea.vmem %s1083_s20, 64  ;;  %p1085_p6 = scmp.lt.s32.totalorder %s203_s30, %s1083_s20 }
  0x41   : > { %p1080_p11 = pnand %p1078_p1, %p1034_p3  ;;  %p1086_p7 = scmp.lt.s32.totalorder %s1084_s22, %s1077_s29 }
  0x43   : > { %p1081_p12 = pneg %p1080_p11  ;;  %p1087_p2 = por %p1086_p7, %p1085_p6 }
  0x45   : > { %p1088_p4 = pnand %p1087_p2, %p1081_p12 }
  0x47   : > { %1091 = shalt.err (!%p1088_p4)
}
  0x48   : > { %991 = dma.hbm_to_vmem [thread:$0]  (!%p1263_p13), %s1310_s23, 32, %s203_s30, %s191_s8  }
  0x49   : > { %p1572_p10 = scmp.ne.s32.totalorder %s1571_s9, 0 }
  0x4a   : > { %s1335_s25 = sand.u32 (!%p1572_p10), 1, %s1154_s16   ;;  %p1573_p6 = scmp.ne.s32.totalorder (!%p1572_p10), %s1565_s26, 0 }
  0x4b   : > { %224 = sbr.rel (%p1572_p10) target bundleno = 614 (0x266), region = 36  ;;  %s774_s10 = sshll.u32 (!%p1572_p10), %s1335_s25, 3 }
  0x4c   : > { %s227_s12 = scalar_lea.sflag (!%p1572_p10), [#allocation3], %s1335_s25  ;;  %s1339_s5 = scalar_lea.vmem (!%p1572_p10), [#allocation2], %s774_s10 }
  0x52   : > { %1137 = dma.done.wait (%p1573_p6), %s227_s12, 128  }
  0x53   : > { %1139 = vsyncadd (%p1573_p6), %s227_s12, 4294967168  ;;  %s775_s11 = sshll.u32 %s1335_s25, 1  ;;  %s236_s9 = scalar_lea.sflag [#allocation6], %s1335_s25 }
  0x54   : > { %s239_s23 = scalar_lea.vmem [#allocation5], %s775_s11 }
  0x55   : > { %1141 = dma.done.wait (%p1573_p6), %s236_s9, 32  }
  0x56   : > { %1143 = vsyncadd (%p1573_p6), %s236_s9, 4294967264  ;;  %v282_v0 = vlaneseq  ;;  %v315_v5 = vld [vmem:[%s239_s23] sm:$0x3]  ;;  %v1166_v12 = vmov 1.0|1.0   ;;  %v1403_v19 = vld [vmem:[%s1339_s5] sm:$0xff] }
  0x57   : > { %v518_v22 = vcombine.high %v1403_v19, %v1403_v19  ;;  %p275_p13 = scmp.lt.s32.totalorder %s1214_s19, 1  ;;  %s906_s10 = sshll.u32 %s1214_s19, 4 }
  0x58   : > { %v1352_v1 = vshrl.u32 %v282_v0, 7  ;;  %s274_s5 = scalar_lea.vmem [#allocation7], %s1335_s25  ;;  %p1574_p7 = scmp.ne.s32.totalorder %s1566_s27, 0 }
  0x59   : > { %584 = vmatprep.mubr.f32.mxu0 %v518_v22  ;;  %s276_s26 = scalar_select %p275_p13, %s1214_s19, 1 }
  0x5a   : > { %v318_v2 = vsub.s32 0, %v1352_v1  ;;  %v322_v3 = vsub.s32 1, %v1352_v1  ;;  %v284_v4 = vadd.s32 8, %v1352_v1  ;;  %v285_v6 = vadd.s32 16, %v1352_v1  ;;  %s654_s11 = sshll.u32 %s274_s5, 4  ;;  %s642_s19 = scalar_lea.sflag [#allocation4], %s1335_s25  ;;  %s1515_s11 = int_to_ptr.vmem [resolvable:$true] %s654_s11 }
  0x5b   : > { %v286_v7 = vadd.s32 24, %v1352_v1  ;;  %v287_v10 = vadd.s32 32, %v1352_v1  ;;  %v288_v11 = vadd.s32 40, %v1352_v1  ;;  %v289_v13 = vadd.s32 48, %v1352_v1  ;;  %s776_s30 = sshll.u32 %s276_s26, 2  ;;  %s277_s7 = scalar_lea.vmem %s1559_s2, %s276_s26 }
  0x5c   : > { %v1361_v8 = vrot.slane %v315_v5, %v318_v2  ;;  %v1363_v9 = vrot.slane %v315_v5, %v322_v3  ;;  %v290_v14 = vadd.s32 56, %v1352_v1  ;;  %v291_v15 = vadd.s32 64, %v1352_v1  ;;  %s281_s13 = scalar_lea.vmem %s1560_s3, %s776_s30  ;;  %v593_v43 = vld [vmem:[%s277_s7] sm:$0x1]  ;;  %s1513_s26 = scalar_lea.hbm %s1561_s4, %s906_s10 }
  0x5d   : > { %v292_v16 = vadd.s32 72, %v1352_v1  ;;  %v293_v17 = vadd.s32 80, %v1352_v1  ;;  %v294_v18 = vadd.s32 88, %v1352_v1  ;;  %v295_v20 = vadd.s32 96, %v1352_v1  ;;  %v594_v45 = vld [vmem:[%s281_s13] sm:$0xf] }
  0x5e   : > { %vm325_vm0 = vcmp.eq.s32.totalorder %v1352_v1, %v1363_v9  ;;  %vm327_vm1 = vcmp.eq.s32.totalorder %v284_v4, %v1363_v9  ;;  %vm324_vm2 = vcmp.eq.s32.totalorder %v1352_v1, %v1361_v8  ;;  %vm326_vm3 = vcmp.eq.s32.totalorder %v284_v4, %v1361_v8  ;;  %s1092_s30 = scalar_lea.vmem %s1515_s11, 16  ;;  %s1167_s8 = smov [#allocation7]  }
  0x5f   : > { %vm911_vm4 = vmpackc.low %vm327_vm1, %vm325_vm0  ;;  %vm329_vm5 = vcmp.eq.s32.totalorder %v285_v6, %v1363_v9  ;;  %vm331_vm6 = vcmp.eq.s32.totalorder %v286_v7, %v1363_v9  ;;  %vm328_vm7 = vcmp.eq.s32.totalorder %v285_v6, %v1361_v8  ;;  %vm330_vm8 = vcmp.eq.s32.totalorder %v286_v7, %v1361_v8  ;;  %p1093_p3 = scmp.ne.s32.totalorder %s1515_s11, %s1092_s30  ;;  %s1096_s6 = sshll.u32 %s1167_s8, 4  ;;  %s1097_s6 = int_to_ptr.vmem [resolvable:$false] %s1096_s6 }
  0x60   : > { %912 = vmatprep.subr.msk.bf16.mxu0 %vm911_vm4, %v1166_v12  ;;  %vm913_vm9 = vmpackc.low %vm326_vm3, %vm324_vm2  ;;  %vm333_vm10 = vcmp.eq.s32.totalorder %v287_v10, %v1363_v9  ;;  %vm335_vm11 = vcmp.eq.s32.totalorder %v288_v11, %v1363_v9  ;;  %vm332_vm15 = vcmp.eq.s32.totalorder %v287_v10, %v1361_v8  ;;  %vm334_vm0 = vcmp.eq.s32.totalorder %v288_v11, %v1361_v8  ;;  %s1098_s7 = scalar_lea.vmem %s1097_s6, 32  ;;  %p1099_p9 = scmp.lt.s32.totalorder %s1515_s11, %s1097_s6 }
  0x61   : > { %914 = vmatpush1.bf16.msk.msra.mxu0 %vm913_vm9, %v1166_v12  ;;  %vm915_vm12 = vmpackc.low %vm331_vm6, %vm329_vm5  ;;  %vm337_vm1 = vcmp.eq.s32.totalorder %v289_v13, %v1363_v9  ;;  %vm339_vm2 = vcmp.eq.s32.totalorder %v290_v14, %v1363_v9  ;;  %vm336_vm5 = vcmp.eq.s32.totalorder %v289_v13, %v1361_v8  ;;  %vm338_vm6 = vcmp.eq.s32.totalorder %v290_v14, %v1361_v8  ;;  %p1094_p5 = pnand %p1093_p3, %p1574_p7  ;;  %p1100_p0 = scmp.lt.s32.totalorder %s1098_s7, %s1092_s30 }
  0x62   : > { %916 = vmatprep.subr.msk.bf16.mxu0 %vm915_vm12, %v1166_v12  ;;  %vm917_vm13 = vmpackc.low %vm330_vm8, %vm328_vm7  ;;  %vm341_vm7 = vcmp.eq.s32.totalorder %v291_v15, %v1363_v9  ;;  %vm343_vm8 = vcmp.eq.s32.totalorder %v292_v16, %v1363_v9  ;;  %vm342_vm12 = vcmp.eq.s32.totalorder %v292_v16, %v1361_v8  ;;  %v296_v21 = vadd.s32 104, %v1352_v1 }
  0x63   : > { %vm919_vm14 = vmpackc.low %vm335_vm11, %vm333_vm10  ;;  %vm340_vm11 = vcmp.eq.s32.totalorder %v291_v15, %v1361_v8  ;;  %v297_v23 = vadd.s32 112, %v1352_v1  ;;  %v298_v24 = vadd.s32 120, %v1352_v1  ;;  %v299_v25 = vadd.s32 128, %v1352_v1  ;;  %p1095_p8 = pneg %p1094_p5  ;;  %p1101_p1 = por %p1100_p0, %p1099_p9 }
  0x64   : > { %vm921_vm3 = vmpackc.low %vm334_vm0, %vm332_vm15  ;;  %v300_v26 = vadd.s32 136, %v1352_v1  ;;  %v301_v27 = vadd.s32 144, %v1352_v1  ;;  %v302_v28 = vadd.s32 152, %v1352_v1  ;;  %v303_v29 = vadd.s32 160, %v1352_v1 }
  0x65   : > { %918 = vmatpush1.bf16.msk.msra.mxu0 %vm917_vm13, %v1166_v12  ;;  %vm923_vm4 = vmpackc.low %vm339_vm2, %vm337_vm1  ;;  %vm345_vm13 = vcmp.eq.s32.totalorder %v293_v17, %v1363_v9  ;;  %vm344_vm1 = vcmp.eq.s32.totalorder %v293_v17, %v1361_v8  ;;  %vm346_vm2 = vcmp.eq.s32.totalorder %v294_v18, %v1361_v8  ;;  %v304_v30 = vadd.s32 168, %v1352_v1  ;;  %p1102_p11 = pnand %p1101_p1, %p1095_p8 }
  0x66   : > { %920 = vmatprep.subr.msk.bf16.mxu0 %vm919_vm14, %v1166_v12  ;;  %vm925_vm9 = vmpackc.low %vm338_vm6, %vm336_vm5  ;;  %vm347_vm14 = vcmp.eq.s32.totalorder %v294_v18, %v1363_v9  ;;  %v305_v31 = vadd.s32 176, %v1352_v1  ;;  %v306_v32 = vadd.s32 184, %v1352_v1  ;;  %v307_v33 = vadd.s32 192, %v1352_v1 }
  0x67   : > { %vm927_vm10 = vmpackc.low %vm343_vm8, %vm341_vm7  ;;  %vm348_vm7 = vcmp.eq.s32.totalorder %v295_v20, %v1361_v8  ;;  %vm350_vm8 = vcmp.eq.s32.totalorder %v296_v21, %v1361_v8  ;;  %v308_v34 = vadd.s32 200, %v1352_v1  ;;  %v309_v35 = vadd.s32 208, %v1352_v1 }
  0x68   : > { %vm929_vm15 = vmpackc.low %vm342_vm12, %vm340_vm11  ;;  %v310_v36 = vadd.s32 216, %v1352_v1  ;;  %v311_v37 = vadd.s32 224, %v1352_v1  ;;  %v312_v38 = vadd.s32 232, %v1352_v1  ;;  %v313_v39 = vadd.s32 240, %v1352_v1 }
  0x69   : > { %922 = vmatpush1.bf16.msk.msra.mxu0 %vm921_vm3, %v1166_v12  ;;  %vm931_vm0 = vmpackc.low %vm347_vm14, %vm345_vm13  ;;  %vm349_vm3 = vcmp.eq.s32.totalorder %v295_v20, %v1363_v9  ;;  %vm352_vm13 = vcmp.eq.s32.totalorder %v297_v23, %v1361_v8  ;;  %vm354_vm14 = vcmp.eq.s32.totalorder %v298_v24, %v1361_v8  ;;  %v314_v40 = vadd.s32 248, %v1352_v1 }
  0x6a   : > { %924 = vmatprep.subr.msk.bf16.mxu0 %vm923_vm4, %v1166_v12  ;;  %vm351_vm4 = vcmp.eq.s32.totalorder %v296_v21, %v1363_v9  ;;  %vm933_vm5 = vmpackc.low %vm346_vm2, %vm344_vm1  ;;  %v600_v47 = vrot.slane %v593_v43, %v318_v2 }
  0x6b   : > { %vm935_vm6 = vmpackc.low %vm351_vm4, %vm349_vm3  ;;  %vm356_vm3 = vcmp.eq.s32.totalorder %v299_v25, %v1361_v8  ;;  %vm358_vm4 = vcmp.eq.s32.totalorder %v300_v26, %v1361_v8 }
  0x6c   : > { %vm937_vm11 = vmpackc.low %vm350_vm8, %vm348_vm7 }
  0x6d   : > { %926 = vmatpush1.bf16.msk.msra.mxu0 %vm925_vm9, %v1166_v12  ;;  %vm353_vm9 = vcmp.eq.s32.totalorder %v297_v23, %v1363_v9  ;;  %vm941_vm1 = vmpackc.low %vm354_vm14, %vm352_vm13 }
  0x6e   : > { %928 = vmatprep.subr.msk.bf16.mxu0 %vm927_vm10, %v1166_v12  ;;  %vm355_vm10 = vcmp.eq.s32.totalorder %v298_v24, %v1363_v9  ;;  %vm945_vm7 = vmpackc.low %vm358_vm4, %vm356_vm3 }
  0x6f   : > { %vm939_vm12 = vmpackc.low %vm355_vm10, %vm353_vm9  ;;  %vm360_vm9 = vcmp.eq.s32.totalorder %v301_v27, %v1361_v8  ;;  %vm362_vm10 = vcmp.eq.s32.totalorder %v302_v28, %v1361_v8 }
  0x70   : > { %vm949_vm13 = vmpackc.low %vm362_vm10, %vm360_vm9 }
  0x71   : > { %930 = vmatpush1.bf16.msk.msra.mxu0 %vm929_vm15, %v1166_v12  ;;  %vm357_vm15 = vcmp.eq.s32.totalorder %v299_v25, %v1363_v9 }
  0x72   : > { %932 = vmatprep.subr.msk.bf16.mxu0 %vm931_vm0, %v1166_v12  ;;  %vm359_vm0 = vcmp.eq.s32.totalorder %v300_v26, %v1363_v9 }
  0x73   : > { %vm943_vm2 = vmpackc.low %vm359_vm0, %vm357_vm15  ;;  %vm364_vm15 = vcmp.eq.s32.totalorder %v303_v29, %v1361_v8  ;;  %vm366_vm0 = vcmp.eq.s32.totalorder %v304_v30, %v1361_v8 }
  0x74   : > { %vm953_vm3 = vmpackc.low %vm366_vm0, %vm364_vm15 }
  0x75   : > { %934 = vmatpush1.bf16.msk.msra.mxu0 %vm933_vm5, %v1166_v12  ;;  %vm361_vm5 = vcmp.eq.s32.totalorder %v301_v27, %v1363_v9 }
  0x76   : > { %936 = vmatprep.subr.msk.bf16.mxu0 %vm935_vm6, %v1166_v12  ;;  %vm363_vm6 = vcmp.eq.s32.totalorder %v302_v28, %v1363_v9 }
  0x77   : > { %vm947_vm8 = vmpackc.low %vm363_vm6, %vm361_vm5  ;;  %vm368_vm5 = vcmp.eq.s32.totalorder %v305_v31, %v1361_v8  ;;  %vm370_vm6 = vcmp.eq.s32.totalorder %v306_v32, %v1361_v8 }
  0x78   : > { %vm957_vm9 = vmpackc.low %vm370_vm6, %vm368_vm5 }
  0x79   : > { %938 = vmatpush1.bf16.msk.msra.mxu0 %vm937_vm11, %v1166_v12  ;;  %vm365_vm11 = vcmp.eq.s32.totalorder %v303_v29, %v1363_v9 }
  0x7a   : > { %940 = vmatprep.subr.msk.bf16.mxu0 %vm939_vm12, %v1166_v12  ;;  %vm367_vm12 = vcmp.eq.s32.totalorder %v304_v30, %v1363_v9 }
  0x7b   : > { %vm951_vm14 = vmpackc.low %vm367_vm12, %vm365_vm11  ;;  %vm372_vm11 = vcmp.eq.s32.totalorder %v307_v33, %v1361_v8  ;;  %vm374_vm12 = vcmp.eq.s32.totalorder %v308_v34, %v1361_v8 }
  0x7c   : > { %vm961_vm15 = vmpackc.low %vm374_vm12, %vm372_vm11 }
  0x7d   : > { %942 = vmatpush1.bf16.msk.msra.mxu0 %vm941_vm1, %v1166_v12  ;;  %vm369_vm1 = vcmp.eq.s32.totalorder %v305_v31, %v1363_v9 }
  0x7e   : > { %944 = vmatprep.subr.msk.bf16.mxu0 %vm943_vm2, %v1166_v12  ;;  %vm371_vm2 = vcmp.eq.s32.totalorder %v306_v32, %v1363_v9 }
  0x7f   : > { %vm955_vm4 = vmpackc.low %vm371_vm2, %vm369_vm1  ;;  %vm376_vm1 = vcmp.eq.s32.totalorder %v309_v35, %v1361_v8  ;;  %vm378_vm2 = vcmp.eq.s32.totalorder %v310_v36, %v1361_v8 }
  0x80   : > { %vm965_vm5 = vmpackc.low %vm378_vm2, %vm376_vm1  ;;  %vm609_vm1 = vcmask 1043456   ;;  %vm620_vm2 = vcmask 1040384  }
  0x81   : > { %946 = vmatpush1.bf16.msk.msra.mxu0 %vm945_vm7, %v1166_v12  ;;  %vm373_vm7 = vcmp.eq.s32.totalorder %v307_v33, %v1363_v9  ;;  %v621_v56 = vsel %vm620_vm2, %v593_v43, 0.0 }
  0x82   : > { %948 = vmatprep.subr.msk.bf16.mxu0 %vm947_vm8, %v1166_v12  ;;  %vm375_vm8 = vcmp.eq.s32.totalorder %v308_v34, %v1363_v9 }
  0x83   : > { %vm959_vm10 = vmpackc.low %vm375_vm8, %vm373_vm7  ;;  %vm380_vm7 = vcmp.eq.s32.totalorder %v311_v37, %v1361_v8  ;;  %vm382_vm8 = vcmp.eq.s32.totalorder %v312_v38, %v1361_v8 }
  0x84   : > { %vm969_vm11 = vmpackc.low %vm382_vm8, %vm380_vm7 }
  0x85   : > { %950 = vmatpush1.bf16.msk.msra.mxu0 %vm949_vm13, %v1166_v12  ;;  %vm377_vm13 = vcmp.eq.s32.totalorder %v309_v35, %v1363_v9 }
  0x86   : > { %952 = vmatprep.subr.msk.bf16.mxu0 %vm951_vm14, %v1166_v12  ;;  %vm379_vm14 = vcmp.eq.s32.totalorder %v310_v36, %v1363_v9 }
  0x87   : > { %vm963_vm0 = vmpackc.low %vm379_vm14, %vm377_vm13  ;;  %vm384_vm13 = vcmp.eq.s32.totalorder %v313_v39, %v1361_v8  ;;  %vm386_vm14 = vcmp.eq.s32.totalorder %v314_v40, %v1361_v8  ;;  %v633_v8 = vand.u32 127, %v282_v0 }
  0x89   : > { %954 = vmatpush1.bf16.msk.msra.mxu0 %vm953_vm3, %v1166_v12  ;;  %vm381_vm3 = vcmp.eq.s32.totalorder %v311_v37, %v1363_v9 }
  0x8a   : > { %956 = vmatprep.subr.msk.bf16.mxu0 %vm955_vm4, %v1166_v12  ;;  %vm383_vm4 = vcmp.eq.s32.totalorder %v312_v38, %v1363_v9 }
  0x8b   : > { %vm967_vm6 = vmpackc.low %vm383_vm4, %vm381_vm3  ;;  %vm635_vm3 = vcmp.eq.s32.totalorder %v633_v8, 1  ;;  %vm634_vm4 = vcmp.eq.s32.totalorder %v633_v8, 0 }
  0x8d   : > { %958 = vmatpush1.bf16.msk.msra.mxu0 %vm957_vm9, %v1166_v12  ;;  %vm385_vm9 = vcmp.eq.s32.totalorder %v313_v39, %v1363_v9 }
  0x8e   : > { %960 = vmatprep.subr.msk.bf16.mxu0 %vm959_vm10, %v1166_v12  ;;  %vm387_vm10 = vcmp.eq.s32.totalorder %v314_v40, %v1363_v9 }
  0x8f   : > { %vm971_vm12 = vmpackc.low %vm387_vm10, %vm385_vm9 }
  0x91   : > { %962 = vmatpush1.bf16.msk.msra.mxu0 %vm961_vm15, %v1166_v12  ;;  %vm973_vm15 = vmpackc.low %vm386_vm14, %vm384_vm13 }
  0x92   : > { %964 = vmatprep.subr.msk.bf16.mxu0 %vm963_vm0, %v1166_v12 }
  0x95   : > { %966 = vmatpush1.bf16.msk.msra.mxu0 %vm965_vm5, %v1166_v12 }
  0x96   : > { %968 = vmatprep.subr.msk.bf16.mxu0 %vm967_vm6, %v1166_v12 }
  0x99   : > { %970 = vmatpush1.bf16.msk.msra.mxu0 %vm969_vm11, %v1166_v12 }
  0x9a   : > { %972 = vmatprep.subr.msk.bf16.mxu0 %vm971_vm12, %v1166_v12 }
  0x9d   : > { %974 = vmatpush1.bf16.msk.msra.mxu0 %vm973_vm15, %v1166_v12 }
  0xa0   : > { %585 = vmatmul.mubr.f32.vlgmr.msra.gmra.mrb[0].mxu0 %v1403_v19 }
 0x173   : > { %v586_v41 = vpop.f32.mrb[0].mxu0 }
 0x174   : > { %v588_v42 = vpop.f32.mrb[1].mxu0 }
 0x175   : > { %v591_v44 = vadd.f32 %v588_v42, %v586_v41 }
 0x177   : > { %v592_v46 = vmul.f32 0.5, %v591_v44 }
 0x179   : > { %v595_v48 = vsub.f32 %v592_v46, %v594_v45 }
 0x17b   : > { %v602_v49 = vmul.f32 %v600_v47, %v595_v48 }
 0x17d   : > { %v603_v50 = vand.u32 2147483647, %v602_v49  ;;  %v605_v51 = vmul.f32 0.5, %v602_v49 }
 0x17f   : > { %vm604_vm0 = vcmp.lt.f32.partialorder %v603_v50, 1.0  ;;  %v606_v52 = vmul.f32 %v605_v51, %v602_v49  ;;  %v905_v53 = vadd.f32 -0.5, %v603_v50 }
 0x181   : > { %v608_v54 = vsel %vm604_vm0, %v606_v52, %v905_v53 }
 0x182   : > { %v610_v55 = vsel %vm609_vm1, %v608_v54, 0.0 }
 0x183   : > { %611 = vadd.xlane.f32.xlu0 %v610_v55 }
 0x187   : > { %622 = vadd.xlane.f32.xlu0 %v621_v56 }
 0x210   : > { %v612_v57 = vpop.xlane.xlu0 %611 }
 0x211   : > { %v613_v58 = vrot.slane %v612_v57, 4 }
 0x213   : > { %v614_v59 = vadd.f32 %v613_v58, %v612_v57 }
 0x214   : > { %v623_v60 = vpop.xlane.xlu0 %622 }
 0x215   : > { %v615_v61 = vrot.slane %v614_v59, 2  ;;  %v624_v62 = vrot.slane %v623_v60, 4 }
 0x217   : > { %v625_v63 = vadd.f32 %v624_v62, %v623_v60  ;;  %v616_v1 = vadd.f32 %v615_v61, %v614_v59 }
 0x219   : > { %v626_v2 = vrot.slane %v625_v63, 2  ;;  %v617_v3 = vrot.slane %v616_v1, 1 }
 0x21b   : > { %v627_v4 = vadd.f32 %v626_v2, %v625_v63  ;;  %v618_v5 = vadd.f32 %v617_v3, %v616_v1 }
 0x21d   : > { %975 = vpush %v618_v5  ;;  %v628_v6 = vrot.slane %v627_v4, 1 }
 0x21f   : > { %v629_v7 = vadd.f32 %v628_v6, %v627_v4 }
 0x221   : > { %977 = vpush %v629_v7 }
 0x24e   : > { %s976_s20 = spop %975 }
 0x24f   : > { %v638_v10 = vstv %s976_s20 }
 0x252   : > { %s978_s22 = spop %977 }
 0x253   : > { %s631_s12 = smul.f32 4.0, %s978_s22 }
 0x255   : > { %v636_v9 = vstv %s631_s12 }
 0x256   : > { %v637_v11 = vsel %vm635_vm3, %v636_v9, 0.0 }
 0x257   : > { %v639_v0 = vsel %vm634_vm4, %v638_v10, %v637_v11 }
 0x258   : > { %640 = vst [vmem:[%s274_s5] sm:$0x1] %v639_v0 }
 0x259   : > { %1105 = shalt.err (!%p1102_p11)
}
 0x25a   : > { %s1106_s25 = scalar_lea.hbm %s1513_s26, 16  ;;  %s1110_s13 = scalar_lea.hbm %s1561_s4, 32 }
 0x25b   : > { %p1107_p12 = scmp.ne.s32.totalorder %s1513_s26, %s1106_s25  ;;  %p1111_p10 = scmp.lt.u32.totalorder %s1513_s26, %s1561_s4 }
 0x25c   : > { %p1112_p6 = scmp.lt.u32.totalorder %s1110_s13, %s1106_s25  ;;  %p1114_p3 = scmp.lt.u32.totalorder %s1106_s25, %s1513_s26 }
 0x25d   : > { %p1108_p2 = pnand %p1107_p12, %p1574_p7 }
 0x25e   : > { %p1113_p13 = por %p1112_p6, %p1111_p10 }
 0x25f   : > { %p1109_p4 = pneg %p1108_p2 }
 0x260   : > { %p1115_p5 = por %p1114_p3, %p1113_p13 }
 0x262   : > { %p1116_p8 = pnand %p1115_p5, %p1109_p4 }
 0x264   : > { %1119 = shalt.err (!%p1116_p8)
}
 0x265   : > { %983 = dma.vmem_to_hbm [thread:$0]  (%p1574_p7), %s1515_s11, 16, %s1513_s26, %s642_s19  }
 0x266 PF: > { %s666_s10 = sand.u32 1, %s1150_s15   ;;  %p1575_p9 = scmp.ne.s32.totalorder %s1567_s28, 0 }
 0x267   : > { %p1576_p0 = scmp.ge.s32.totalorder %s1162_s18, 2  ;;  %s667_s12 = scalar_lea.sflag [#allocation4], %s666_s10 }
 0x269   : > { %p993_p1 = pnand %p1576_p0, %p1575_p9 }
 0x26b   : > { %1145 = dma.done.wait (!%p993_p1), %s667_s12, 16  }
 0x26c   : > { %1147 = vsyncadd (!%p993_p1), %s667_s12, 4294967280  ;;  %p20_p11 = scmp.ge.s32.totalorder %s1218_s21, 4   ;;  %s1577_s15 = smov %s1154_s16 }
 0x26d   : > { %s1578_s16 = smov %s1158_s17  ;;  %s1579_s17 = smov %s1230_s24 }
 0x26e   : > { %s1580_s18 = smov %s1218_s21  ;;  %22 = sbr.rel (!%p20_p11) target bundleno = 7 (0x7), region = 100 }
 0x275   :  { %671 = vsyncpa [#allocation3], 1 }
 0x276   :  { %673 = vsyncpa [#allocation3 + $0x1], 1 }
 0x277   :  { %674 = vsyncpa [#allocation6], 1 }
 0x278   :  { %676 = vsyncpa [#allocation6 + $0x1], 1 }
 0x279   :  { %677 = vsyncpa [#allocation4], 1 }
 0x27a   :  { %679 = vsyncpa [#allocation4 + $0x1], 1 }

</bundles_post_ra>
